<compile_context>
chip_gen: v6e
topology: v6e:2x2x1
jax: 0.10.0
libtpu: 0.0.40
codegen_flags: <defaults>
</compile_context>

<pallas_src>
import math

import jax
import jax.numpy as jnp
import numpy as np
from jax.experimental import pallas as pl
from jax.experimental.pallas import tpu as pltpu


def _round_up(x, m):
    return ((x + m - 1) // m) * m


def _round_down(x, m):
    return (x // m) * m


def _make_kernel(n_in, pack):
    """Fused concat -> Linear -> SENet kernel.  pack > 1 => lane-dense output store."""

    def kernel(*refs):
        x_refs = refs[:n_in]
        wf_refs = refs[n_in:2 * n_in]
        bf_ref, w1_ref, w2_ref, o_ref = refs[2 * n_in:]

        # ---- fusion Linear with the concat fused in -------------------------
        # emb = concat(x_i, axis=1) @ Wf + bf = sum_i x_i @ Wf_i + bf
        # Matmuls in native dtype (bf16 MXU fast path), f32 accumulation.
        # TODO(synk): for many tiny inputs (n_in > ~4), copy tiles into one
        # contiguous [tb, Dm] VMEM scratch and issue a single K=Dm dot instead.
        emb = jnp.dot(x_refs[0][...], wf_refs[0][...],
                      preferred_element_type=jnp.float32)
        for i in range(1, n_in):
            emb = emb + jnp.dot(x_refs[i][...], wf_refs[i][...],
                                preferred_element_type=jnp.float32)
        emb = emb + bf_ref[...].astype(jnp.float32)

        # ---- SENet gate: squeeze -> relu -> excitation -> sigmoid -----------
        g = jnp.dot(emb.astype(w1_ref.dtype), w1_ref[...],
                    preferred_element_type=jnp.float32)
        g = jnp.maximum(g, 0.0)
        g = jnp.dot(g.astype(w2_ref.dtype), w2_ref[...],
                    preferred_element_type=jnp.float32)
        g = jax.nn.sigmoid(g)

        y = emb * g
        if pack > 1:
            tb, h = y.shape
            y = y.reshape(tb // pack, pack * h)   # lane-dense [tb/pack, 128]
        o_ref[...] = y.astype(o_ref.dtype)

    return kernel


def concat_dense_se(inputs, wf, bf, w1, w2, *, max_block_b=4096):
    """Fused ConcatDenseSE forward (eval mode).

    inputs: list of [B, d_i].   wf: [sum(d_i), H]   bf: [H] or [1, H]
    w1: [H, H // se_ratio]      w2: [H // se_ratio, H]
    Returns [B, H] in the inputs' dtype.
    """
    # TODO(synk): training-mode dropout not implemented; eval-mode dropout is identity.
    n_in = len(inputs)
    dims = [int(x.shape[1]) for x in inputs]
    B = int(inputs[0].shape[0])
    Dm = int(sum(dims))
    H = int(wf.shape[1])
    assert int(wf.shape[0]) == Dm
    if bf.ndim == 1:
        bf = bf.reshape(1, H)

    out_dtype = inputs[0].dtype
    itemsize = jnp.dtype(out_dtype).itemsize

    # Pre-split the fusion weight per input (host-side, one-time): the kernel then
    # never slices wf at a sublane-misaligned row offset.
    offsets = np.cumsum([0] + dims)
    wf_parts = [wf[int(offsets[i]):int(offsets[i + 1]), :] for i in range(n_in)]

    # ---- lane-dense output packing ------------------------------------------
    pack = 128 // H if (H < 128 and 128 % H == 0) else 1
    can_pack = pack > 1 and (B % pack == 0)
    if not can_pack:
        pack = 1

    # ---- batch tile sized from this generation's VMEM ------------------------
    try:
        vmem_cap = int(pltpu.get_tpu_info().vmem_capacity_bytes)
    except Exception:
        vmem_cap = 64 * 2 ** 20                        # conservative: v7x per-TC
    vmem_budget = max(16 * 2 ** 20, (vmem_cap * 3) // 4)  # ~48 MiB v7x, ~96 MiB v5e/v6e

    wbytes = sum(int(np.prod(w.shape)) * jnp.dtype(w.dtype).itemsize
                 for w in (*wf_parts, bf, w1, w2))
    row_bytes = (Dm + H) * itemsize                    # input + output bytes per row
    sublane_pack = max(1, 4 // itemsize)               # rows per sublane (1 f32, 2 bf16)
    align = 8 * sublane_pack
    if can_pack:
        align = (align * pack) // math.gcd(align, pack)   # lcm(align, pack)

    tb_vmem = (vmem_budget - 2 * wbytes) // (2 * row_bytes)
    tb_vmem = max(align, int(tb_vmem))

    if B <= align:
        tb = B                                         # one tile == full (tiny) batch
    else:
        tb = min(tb_vmem, max_block_b, B)
        if B >= 2 * align:
            # Keep >= 2 grid steps so ("parallel",) can shard across both v7x
            # TensorCores (no effect on single-TC v5e/v6e).
            tb = min(tb, _round_up(-(-B // 2), align))
        tb = max(align, _round_down(tb, align))
    grid = (pl.cdiv(B, tb),)

    # VMEM request: double-buffered activation tiles + (worst-case double-buffered)
    # resident weights + 50% margin, capped at ~75% of physical capacity.
    act_bytes = 2 * tb * row_bytes
    vmem_limit = int(min(vmem_budget,
                         max(16 * 2 ** 20, ((act_bytes + 2 * wbytes) * 3) // 2)))

    def _run(pack_out, single_buffer_weights):
        kernel = _make_kernel(n_in, pack if pack_out else 1)

        def wspec(shape):
            if single_buffer_weights:
                return pl.BlockSpec(shape, lambda i: (0, 0),
                                    pipeline_mode=pl.Buffered(1))
            return pl.BlockSpec(shape, lambda i: (0, 0))

        in_specs = [pl.BlockSpec((tb, d), lambda i: (i, 0)) for d in dims]
        in_specs += [wspec(p.shape) for p in wf_parts]         # resident weights
        in_specs += [wspec(bf.shape), wspec(w1.shape), wspec(w2.shape)]

        if pack_out:
            out_shape = jax.ShapeDtypeStruct((B // pack, pack * H), out_dtype)
            out_specs = pl.BlockSpec((tb // pack, pack * H), lambda i: (i, 0))
        else:
            out_shape = jax.ShapeDtypeStruct((B, H), out_dtype)
            out_specs = pl.BlockSpec((tb, H), lambda i: (i, 0))
        # TODO(synk): sweep pl.Buffered(3) on activation specs if xprof still shows
        # exposed DMA between grid steps after these changes.

        out = pl.pallas_call(
            kernel,
            out_shape=out_shape,
            grid_spec=pltpu.PrefetchScalarGridSpec(
                num_scalar_prefetch=0,
                grid=grid,
                in_specs=in_specs,
                out_specs=out_specs,
            ),
            compiler_params=pltpu.CompilerParams(
                dimension_semantics=("parallel",),
                vmem_limit_bytes=vmem_limit,
            ),
        )(*inputs, *wf_parts, bf, w1, w2)

        if pack_out:
            out = out.reshape(B, H)    # free row-major un-packing
        return out

    # Graceful degradation if a lowering feature is rejected on this jax/libtpu
    # combo: first drop lane-dense packing, then weight single-buffering.
    attempts = [(can_pack, True)]
    if can_pack:
        attempts += [(False, True), (True, False)]
    attempts += [(False, False)]
    last_err = None
    for pack_out, single_buf in attempts:
        try:
            return _run(pack_out, single_buf)
        except Exception as e:          # pragma: no cover - fallback path
            last_err = e
    raise last_err


if __name__ == "__main__":
    # Small shapes consistent with the module: two 32-dim input embeddings
    # (multimodal_hidden_size = 64), hidden_size = 32, se_ratio = 8 -> squeeze 4.
    d1, d2 = 32, 32
    hidden = 32
    se_ratio = 8
    squeeze = hidden // se_ratio

    key = jax.random.PRNGKey(0)
    (k_in1, k_in2, k_wf, k_bf, k_w1, k_w2, k_b1, k_b2) = jax.random.split(key, 8)

    # Parameters stored as [in, out] (transposed vs. PyTorch nn.Linear).
    wf = jax.random.normal(k_wf, (d1 + d2, hidden), dtype=jnp.float32) * 0.05
    bf = jax.random.normal(k_bf, (1, hidden), dtype=jnp.float32) * 0.05
    w1 = jax.random.normal(k_w1, (hidden, squeeze), dtype=jnp.float32) * 0.05
    w2 = jax.random.normal(k_w2, (squeeze, hidden), dtype=jnp.float32) * 0.05

    def ref_fn(inps, wf_, bf_, w1_, w2_):
        x = jnp.concatenate([a.astype(jnp.float32) for a in inps], axis=1)
        emb = x @ wf_.astype(jnp.float32) + bf_.astype(jnp.float32)
        gates = jax.nn.sigmoid(jnp.maximum(emb @ w1_.astype(jnp.float32), 0.0)
                               @ w2_.astype(jnp.float32))
        return emb * gates

    # --- tiny batch (B=2): unpacked, single-tile path -------------------------
    B = 2
    inp1 = jax.random.normal(k_in1, (B, d1), dtype=jnp.float32)
    inp2 = jax.random.normal(k_in2, (B, d2), dtype=jnp.float32)
    out = concat_dense_se([inp1, inp2], wf, bf, w1, w2)
    jax.block_until_ready(out)
    assert out.shape == (B, hidden)
    assert jnp.allclose(out, ref_fn([inp1, inp2], wf, bf, w1, w2),
                        atol=1e-5, rtol=1e-5)

    # --- larger batch (B=256): lane-dense packed output + 2 grid steps --------
    B2 = 256
    inp1b = jax.random.normal(k_b1, (B2, d1), dtype=jnp.float32)
    inp2b = jax.random.normal(k_b2, (B2, d2), dtype=jnp.float32)
    out2 = concat_dense_se([inp1b, inp2b], wf, bf, w1, w2)
    jax.block_until_ready(out2)
    assert out2.shape == (B2, hidden)
    assert jnp.allclose(out2, ref_fn([inp1b, inp2b], wf, bf, w1, w2),
                        atol=1e-5, rtol=1e-5)

    # --- bf16 fast path (native bf16 MXU inputs/weights, f32 accumulation) ----
    bf16 = jnp.bfloat16
    out_bf16 = concat_dense_se(
        [inp1b.astype(bf16), inp2b.astype(bf16)],
        wf.astype(bf16), bf.astype(bf16), w1.astype(bf16), w2.astype(bf16))
    jax.block_until_ready(out_bf16)
    assert out_bf16.shape == (B2, hidden)
    ref_bf16 = ref_fn([inp1b.astype(bf16), inp2b.astype(bf16)],
                      wf.astype(bf16), bf.astype(bf16),
                      w1.astype(bf16), w2.astype(bf16))
    assert jnp.allclose(out_bf16.astype(jnp.float32), ref_bf16,
                        atol=5e-2, rtol=5e-2)

    print("KERNEL_OK")
</pallas_src>

<mosaic_0001>
module attributes {stable_mosaic.version = 11 : i64} {
  func.func @kernel(%arg0: i32, %arg1: memref<2x32xf32, #tpu.memory_space<vmem>>, %arg2: memref<2x32xf32, #tpu.memory_space<vmem>>, %arg3: memref<32x32xf32, #tpu.memory_space<vmem>>, %arg4: memref<32x32xf32, #tpu.memory_space<vmem>>, %arg5: memref<1x32xf32, #tpu.memory_space<vmem>>, %arg6: memref<32x4xf32, #tpu.memory_space<vmem>>, %arg7: memref<4x32xf32, #tpu.memory_space<vmem>>, %arg8: memref<2x32xf32, #tpu.memory_space<vmem>>) attributes {dimension_semantics = [#tpu.dimension_semantics<parallel>], iteration_bounds = array<i64: 1>, scalar_prefetch = 0 : i64, scratch_operands = 0 : i64, tpu.core_type = #tpu.core_type<tc>, window_params = [{transform_indices = @transform_0, window_bounds = array<i64: 2, 32>}, {transform_indices = @transform_1, window_bounds = array<i64: 2, 32>}, {pipeline_mode = #tpu.pipeline_mode<synchronous>, transform_indices = @transform_2, window_bounds = array<i64: 32, 32>}, {pipeline_mode = #tpu.pipeline_mode<synchronous>, transform_indices = @transform_3, window_bounds = array<i64: 32, 32>}, {pipeline_mode = #tpu.pipeline_mode<synchronous>, transform_indices = @transform_4, window_bounds = array<i64: 1, 32>}, {pipeline_mode = #tpu.pipeline_mode<synchronous>, transform_indices = @transform_5, window_bounds = array<i64: 32, 4>}, {pipeline_mode = #tpu.pipeline_mode<synchronous>, transform_indices = @transform_6, window_bounds = array<i64: 4, 32>}, {transform_indices = @transform_7, window_bounds = array<i64: 2, 32>}]} {
    %c0 = arith.constant 0 : index
    %c0_0 = arith.constant 0 : index
    %0 = vector.load %arg1[%c0, %c0_0] : memref<2x32xf32, #tpu.memory_space<vmem>>, vector<2x32xf32>
    %c0_1 = arith.constant 0 : index
    %c0_2 = arith.constant 0 : index
    %1 = vector.load %arg3[%c0_1, %c0_2] : memref<32x32xf32, #tpu.memory_space<vmem>>, vector<32x32xf32>
    %cst = arith.constant dense<0.000000e+00> : vector<2x32xf32>
    %2 = tpu.matmul %0, %1, %cst {dimension_numbers = #tpu.dot_dimension_numbers<[1], [0], [0], [1], [0, 0, 1, 1], [], []>} : vector<2x32xf32>, vector<32x32xf32>, vector<2x32xf32> -> vector<2x32xf32>
    %c0_3 = arith.constant 0 : index
    %c0_4 = arith.constant 0 : index
    %3 = vector.load %arg2[%c0_3, %c0_4] : memref<2x32xf32, #tpu.memory_space<vmem>>, vector<2x32xf32>
    %c0_5 = arith.constant 0 : index
    %c0_6 = arith.constant 0 : index
    %4 = vector.load %arg4[%c0_5, %c0_6] : memref<32x32xf32, #tpu.memory_space<vmem>>, vector<32x32xf32>
    %cst_7 = arith.constant dense<0.000000e+00> : vector<2x32xf32>
    %5 = tpu.matmul %3, %4, %cst_7 {dimension_numbers = #tpu.dot_dimension_numbers<[1], [0], [0], [1], [0, 0, 1, 1], [], []>} : vector<2x32xf32>, vector<32x32xf32>, vector<2x32xf32> -> vector<2x32xf32>
    %6 = arith.addf %2, %5 : vector<2x32xf32>
    %c0_8 = arith.constant 0 : index
    %c0_9 = arith.constant 0 : index
    %7 = vector.load %arg5[%c0_8, %c0_9] : memref<1x32xf32, #tpu.memory_space<vmem>>, vector<1x32xf32>
    %8 = vector.broadcast %7 : vector<1x32xf32> to vector<2x32xf32>
    %9 = arith.addf %6, %8 : vector<2x32xf32>
    %c0_10 = arith.constant 0 : index
    %c0_11 = arith.constant 0 : index
    %10 = vector.load %arg6[%c0_10, %c0_11] : memref<32x4xf32, #tpu.memory_space<vmem>>, vector<32x4xf32>
    %cst_12 = arith.constant dense<0.000000e+00> : vector<2x4xf32>
    %11 = tpu.matmul %9, %10, %cst_12 {dimension_numbers = #tpu.dot_dimension_numbers<[1], [0], [0], [1], [0, 0, 1, 1], [], []>} : vector<2x32xf32>, vector<32x4xf32>, vector<2x4xf32> -> vector<2x4xf32>
    %cst_13 = arith.constant 0.000000e+00 : f32
    %12 = vector.broadcast %cst_13 : f32 to vector<2x4xf32>
    %13 = arith.maximumf %11, %12 : vector<2x4xf32>
    %c0_14 = arith.constant 0 : index
    %c0_15 = arith.constant 0 : index
    %14 = vector.load %arg7[%c0_14, %c0_15] : memref<4x32xf32, #tpu.memory_space<vmem>>, vector<4x32xf32>
    %cst_16 = arith.constant dense<0.000000e+00> : vector<2x32xf32>
    %15 = tpu.matmul %13, %14, %cst_16 {dimension_numbers = #tpu.dot_dimension_numbers<[1], [0], [0], [1], [0, 0, 1, 1], [], []>} : vector<2x4xf32>, vector<4x32xf32>, vector<2x32xf32> -> vector<2x32xf32>
    %16 = arith.negf %15 : vector<2x32xf32>
    %17 = math.exp %16 : vector<2x32xf32>
    %cst_17 = arith.constant 1.000000e+00 : f32
    %18 = vector.broadcast %cst_17 : f32 to vector<2x32xf32>
    %19 = arith.addf %18, %17 : vector<2x32xf32>
    %20 = arith.divf %18, %19 : vector<2x32xf32>
    %21 = arith.mulf %9, %20 : vector<2x32xf32>
    %c0_18 = arith.constant 0 : index
    %c0_19 = arith.constant 0 : index
    %22 = vector.load %arg8[%c0_18, %c0_19] : memref<2x32xf32, #tpu.memory_space<vmem>>, vector<2x32xf32>
    tpu.vector_store %arg8[%c0_18, %c0_19], %21 {strides = array<i32>} : memref<2x32xf32, #tpu.memory_space<vmem>>, vector<2x32xf32>,
    return
  }
  func.func @transform_0(%arg0: i32) -> (i32, i32) {
    %c0_i32 = arith.constant 0 : i32
    %c0_i32_0 = arith.constant 0 : i32
    return %arg0, %c0_i32 : i32, i32
  }
  func.func @transform_1(%arg0: i32) -> (i32, i32) {
    %c0_i32 = arith.constant 0 : i32
    %c0_i32_0 = arith.constant 0 : i32
    return %arg0, %c0_i32 : i32, i32
  }
  func.func @transform_2(%arg0: i32) -> (i32, i32) {
    %c0_i32 = arith.constant 0 : i32
    %c0_i32_0 = arith.constant 0 : i32
    %c0_i32_1 = arith.constant 0 : i32
    return %c0_i32, %c0_i32_0 : i32, i32
  }
  func.func @transform_3(%arg0: i32) -> (i32, i32) {
    %c0_i32 = arith.constant 0 : i32
    %c0_i32_0 = arith.constant 0 : i32
    %c0_i32_1 = arith.constant 0 : i32
    return %c0_i32, %c0_i32_0 : i32, i32
  }
  func.func @transform_4(%arg0: i32) -> (i32, i32) {
    %c0_i32 = arith.constant 0 : i32
    %c0_i32_0 = arith.constant 0 : i32
    %c0_i32_1 = arith.constant 0 : i32
    return %c0_i32, %c0_i32_0 : i32, i32
  }
  func.func @transform_5(%arg0: i32) -> (i32, i32) {
    %c0_i32 = arith.constant 0 : i32
    %c0_i32_0 = arith.constant 0 : i32
    %c0_i32_1 = arith.constant 0 : i32
    return %c0_i32, %c0_i32_0 : i32, i32
  }
  func.func @transform_6(%arg0: i32) -> (i32, i32) {
    %c0_i32 = arith.constant 0 : i32
    %c0_i32_0 = arith.constant 0 : i32
    %c0_i32_1 = arith.constant 0 : i32
    return %c0_i32, %c0_i32_0 : i32, i32
  }
  func.func @transform_7(%arg0: i32) -> (i32, i32) {
    %c0_i32 = arith.constant 0 : i32
    %c0_i32_0 = arith.constant 0 : i32
    return %arg0, %c0_i32 : i32, i32
  }
}

module attributes {stable_mosaic.version = 11 : i64} {
  func.func @kernel(%arg0: i32, %arg1: memref<2x32xf32, #tpu.memory_space<vmem>>, %arg2: memref<2x32xf32, #tpu.memory_space<vmem>>, %arg3: memref<32x32xf32, #tpu.memory_space<vmem>>, %arg4: memref<32x32xf32, #tpu.memory_space<vmem>>, %arg5: memref<1x32xf32, #tpu.memory_space<vmem>>, %arg6: memref<32x4xf32, #tpu.memory_space<vmem>>, %arg7: memref<4x32xf32, #tpu.memory_space<vmem>>, %arg8: memref<2x32xf32, #tpu.memory_space<vmem>>) attributes {dimension_semantics = [#tpu.dimension_semantics<parallel>], iteration_bounds = array<i64: 1>, scalar_prefetch = 0 : i64, scratch_operands = 0 : i64, tpu.core_type = #tpu.core_type<tc>, window_params = [{transform_indices = @transform_0, window_bounds = array<i64: 2, 32>}, {transform_indices = @transform_1, window_bounds = array<i64: 2, 32>}, {pipeline_mode = #tpu.pipeline_mode<synchronous>, transform_indices = @transform_2, window_bounds = array<i64: 32, 32>}, {pipeline_mode = #tpu.pipeline_mode<synchronous>, transform_indices = @transform_3, window_bounds = array<i64: 32, 32>}, {pipeline_mode = #tpu.pipeline_mode<synchronous>, transform_indices = @transform_4, window_bounds = array<i64: 1, 32>}, {pipeline_mode = #tpu.pipeline_mode<synchronous>, transform_indices = @transform_5, window_bounds = array<i64: 32, 4>}, {pipeline_mode = #tpu.pipeline_mode<synchronous>, transform_indices = @transform_6, window_bounds = array<i64: 4, 32>}, {transform_indices = @transform_7, window_bounds = array<i64: 2, 32>}]} {
    %c0 = arith.constant 0 : index
    %c0_0 = arith.constant 0 : index
    %0 = vector.load %arg1[%c0, %c0_0] : memref<2x32xf32, #tpu.memory_space<vmem>>, vector<2x32xf32>
    %c0_1 = arith.constant 0 : index
    %c0_2 = arith.constant 0 : index
    %1 = vector.load %arg3[%c0_1, %c0_2] : memref<32x32xf32, #tpu.memory_space<vmem>>, vector<32x32xf32>
    %cst = arith.constant dense<0.000000e+00> : vector<2x32xf32>
    %2 = tpu.matmul %0, %1, %cst {dimension_numbers = #tpu.dot_dimension_numbers<[1], [0], [0], [1], [0, 0, 1, 1], [], []>} : vector<2x32xf32>, vector<32x32xf32>, vector<2x32xf32> -> vector<2x32xf32>
    %c0_3 = arith.constant 0 : index
    %c0_4 = arith.constant 0 : index
    %3 = vector.load %arg2[%c0_3, %c0_4] : memref<2x32xf32, #tpu.memory_space<vmem>>, vector<2x32xf32>
    %c0_5 = arith.constant 0 : index
    %c0_6 = arith.constant 0 : index
    %4 = vector.load %arg4[%c0_5, %c0_6] : memref<32x32xf32, #tpu.memory_space<vmem>>, vector<32x32xf32>
    %cst_7 = arith.constant dense<0.000000e+00> : vector<2x32xf32>
    %5 = tpu.matmul %3, %4, %cst_7 {dimension_numbers = #tpu.dot_dimension_numbers<[1], [0], [0], [1], [0, 0, 1, 1], [], []>} : vector<2x32xf32>, vector<32x32xf32>, vector<2x32xf32> -> vector<2x32xf32>
    %6 = arith.addf %2, %5 : vector<2x32xf32>
    %c0_8 = arith.constant 0 : index
    %c0_9 = arith.constant 0 : index
    %7 = vector.load %arg5[%c0_8, %c0_9] : memref<1x32xf32, #tpu.memory_space<vmem>>, vector<1x32xf32>
    %8 = vector.broadcast %7 : vector<1x32xf32> to vector<2x32xf32>
    %9 = arith.addf %6, %8 : vector<2x32xf32>
    %c0_10 = arith.constant 0 : index
    %c0_11 = arith.constant 0 : index
    %10 = vector.load %arg6[%c0_10, %c0_11] : memref<32x4xf32, #tpu.memory_space<vmem>>, vector<32x4xf32>
    %cst_12 = arith.constant dense<0.000000e+00> : vector<2x4xf32>
    %11 = tpu.matmul %9, %10, %cst_12 {dimension_numbers = #tpu.dot_dimension_numbers<[1], [0], [0], [1], [0, 0, 1, 1], [], []>} : vector<2x32xf32>, vector<32x4xf32>, vector<2x4xf32> -> vector<2x4xf32>
    %cst_13 = arith.constant 0.000000e+00 : f32
    %12 = vector.broadcast %cst_13 : f32 to vector<2x4xf32>
    %13 = arith.maximumf %11, %12 : vector<2x4xf32>
    %c0_14 = arith.constant 0 : index
    %c0_15 = arith.constant 0 : index
    %14 = vector.load %arg7[%c0_14, %c0_15] : memref<4x32xf32, #tpu.memory_space<vmem>>, vector<4x32xf32>
    %cst_16 = arith.constant dense<0.000000e+00> : vector<2x32xf32>
    %15 = tpu.matmul %13, %14, %cst_16 {dimension_numbers = #tpu.dot_dimension_numbers<[1], [0], [0], [1], [0, 0, 1, 1], [], []>} : vector<2x4xf32>, vector<4x32xf32>, vector<2x32xf32> -> vector<2x32xf32>
    %16 = arith.negf %15 : vector<2x32xf32>
    %17 = math.exp %16 : vector<2x32xf32>
    %cst_17 = arith.constant 1.000000e+00 : f32
    %18 = vector.broadcast %cst_17 : f32 to vector<2x32xf32>
    %19 = arith.addf %18, %17 : vector<2x32xf32>
    %20 = arith.divf %18, %19 : vector<2x32xf32>
    %21 = arith.mulf %9, %20 : vector<2x32xf32>
    %c0_18 = arith.constant 0 : index
    %c0_19 = arith.constant 0 : index
    %22 = vector.load %arg8[%c0_18, %c0_19] : memref<2x32xf32, #tpu.memory_space<vmem>>, vector<2x32xf32>
    tpu.vector_store %arg8[%c0_18, %c0_19], %21 {strides = array<i32>} : memref<2x32xf32, #tpu.memory_space<vmem>>, vector<2x32xf32>,
    return
  }
  func.func @transform_0(%arg0: i32) -> (i32, i32) {
    %c0_i32 = arith.constant 0 : i32
    %c0_i32_0 = arith.constant 0 : i32
    return %arg0, %c0_i32 : i32, i32
  }
  func.func @transform_1(%arg0: i32) -> (i32, i32) {
    %c0_i32 = arith.constant 0 : i32
    %c0_i32_0 = arith.constant 0 : i32
    return %arg0, %c0_i32 : i32, i32
  }
  func.func @transform_2(%arg0: i32) -> (i32, i32) {
    %c0_i32 = arith.constant 0 : i32
    %c0_i32_0 = arith.constant 0 : i32
    %c0_i32_1 = arith.constant 0 : i32
    return %c0_i32, %c0_i32_0 : i32, i32
  }
  func.func @transform_3(%arg0: i32) -> (i32, i32) {
    %c0_i32 = arith.constant 0 : i32
    %c0_i32_0 = arith.constant 0 : i32
    %c0_i32_1 = arith.constant 0 : i32
    return %c0_i32, %c0_i32_0 : i32, i32
  }
  func.func @transform_4(%arg0: i32) -> (i32, i32) {
    %c0_i32 = arith.constant 0 : i32
    %c0_i32_0 = arith.constant 0 : i32
    %c0_i32_1 = arith.constant 0 : i32
    return %c0_i32, %c0_i32_0 : i32, i32
  }
  func.func @transform_5(%arg0: i32) -> (i32, i32) {
    %c0_i32 = arith.constant 0 : i32
    %c0_i32_0 = arith.constant 0 : i32
    %c0_i32_1 = arith.constant 0 : i32
    return %c0_i32, %c0_i32_0 : i32, i32
  }
  func.func @transform_6(%arg0: i32) -> (i32, i32) {
    %c0_i32 = arith.constant 0 : i32
    %c0_i32_0 = arith.constant 0 : i32
    %c0_i32_1 = arith.constant 0 : i32
    return %c0_i32, %c0_i32_0 : i32, i32
  }
  func.func @transform_7(%arg0: i32) -> (i32, i32) {
    %c0_i32 = arith.constant 0 : i32
    %c0_i32_0 = arith.constant 0 : i32
    return %arg0, %c0_i32 : i32, i32
  }
}

</mosaic_0001>

<bundles_post_ra>
// kernel: tpu_custom_call.1
= control target key start
LH: loop header
LB: loop body
LE: loop exit
PB: predicated region body
PF: predicated region fallthrough
CT: control target
= control target key end

     0   :  { %12 = vsyncpa [#allocation3], 0  ;;  %s635_s0 = inlined_call_operand.vmem [shape: f32[2,32], index: 0, kind: input, shape index: {}]   ;;  %s636_s1 = inlined_call_operand.hbm [shape: f32[2,32], index: 1, kind: input, shape index: {}]   ;;  %s637_s2 = inlined_call_operand.vmem [shape: f32[32,32], index: 2, kind: input, shape index: {}]   ;;  %s638_s3 = inlined_call_operand.hbm [shape: f32[32,32], index: 3, kind: input, shape index: {}]   ;;  %s639_s4 = inlined_call_operand.vmem [shape: f32[1,32], index: 4, kind: input, shape index: {}]   ;;  %s640_s5 = inlined_call_operand.vmem [shape: f32[32,4], index: 5, kind: input, shape index: {}]   ;;  %s641_s6 = inlined_call_operand.vmem [shape: f32[4,32], index: 6, kind: input, shape index: {}]   ;;  %s642_s7 = inlined_call_operand.hbm [shape: f32[2,32], index: 7, kind: output, shape index: {}]  }
   0x1   :  { %13 = vsyncpa [#allocation6], 0 }
   0x2   :  { %14 = vsyncpa [#allocation4], 0  ;;  %s539_s24 = smov [#allocation2]   ;;  %s540_s26 = smov [#allocation5]  }
   0x3   :  { %s23_s25 = sshll.u32 %s539_s24, 4  ;;  %s34_s27 = sshll.u32 %s540_s26, 4  ;;  %s24_s25 = int_to_ptr.vmem [resolvable:$true] %s23_s25  ;;  %s35_s27 = int_to_ptr.vmem [resolvable:$true] %s34_s27 }
   0x4   :  { %s481_s28 = scalar_lea.vmem %s24_s25, 32  ;;  %p486_p1 = scmp.lt.s32.totalorder %s24_s25, %s24_s25 }
   0x5   :  { %p482_p0 = scmp.ne.s32.totalorder %s24_s25, %s481_s28  ;;  %p487_p2 = scmp.lt.s32.totalorder %s481_s28, %s481_s28 }
   0x7   :  { %p488_p3 = por %p487_p2, %p486_p1 }
   0x9   :  { %p489_p4 = pnand %p488_p3, %p482_p0 }
   0xb   :  { %492 = shalt.err (!%p489_p4)
}
   0xc   :  { %26 = dma.hbm_to_vmem [thread:$0]  %s636_s1, 32, %s24_s25, [#allocation3]  }
   0xd   :  { %s501_s8 = scalar_lea.vmem %s35_s27, 512  ;;  %p506_p6 = scmp.lt.s32.totalorder %s35_s27, %s35_s27 }
   0xe   :  { %p502_p5 = scmp.ne.s32.totalorder %s35_s27, %s501_s8  ;;  %p507_p7 = scmp.lt.s32.totalorder %s501_s8, %s501_s8 }
  0x10   :  { %p508_p8 = por %p507_p7, %p506_p6 }
  0x12   :  { %p509_p9 = pnand %p508_p8, %p502_p5 }
  0x14   :  { %512 = shalt.err (!%p509_p9)
}
  0x15   :  { %s541_s9 = smov 128   ;;  %s542_s10 = smov 8  }
  0x16   :  { %40 = dma.hbm_to_vmem [thread:$0]  %s638_s3, 512, %s35_s27, [#allocation6], %s541_s9, %s541_s9, %s542_s10  }
  0x17   :  { %533 = dma.done.wait [#allocation3], 32  }
  0x18   :  { %534 = vsyncadd [#allocation3], 4294967264 }
  0x19   :  { %535 = dma.done.wait [#allocation6], 512  }
  0x1a   :  { %536 = vsyncadd [#allocation6], 4294966784  ;;  %v543_v0 = vmov 0.0   ;;  %vm544_vm0 = vmmov 0   ;;  %v62_v1 = vld [vmem:[#allocation5 + $0x18] sm:$0xff]  ;;  %v61_v3 = vld [vmem:[#allocation5 + $0x10] sm:$0xff] }
  0x1b   :  { %424 = vmatprep.subr.mxu0 %v543_v0  ;;  %435 = vmatprep.subr.mxu1 %v543_v0  ;;  %v57_v2 = vld [vmem:[%s637_s2 + $0x18] sm:$0xff]  ;;  %v56_v4 = vld [vmem:[%s637_s2 + $0x10] sm:$0xff]  ;;  %v55_v6 = vld [vmem:[%s637_s2 + $0x8] sm:$0xff]  ;;  %vm63_vm1 = vcmask 261120   ;;  %vm301_vm2 = vcmask 1043456   ;;  %vm297_vm3 = vcmask 31744  }
  0x1c   :  { %432 = vmatprep.mubr.msk.f32.mxu0 %vm544_vm0, %v543_v0  ;;  %443 = vmatprep.mubr.msk.f32.mxu1 %vm544_vm0, %v543_v0  ;;  %v60_v5 = vld [vmem:[#allocation5 + $0x8] sm:$0xff]  ;;  %v59_v7 = vld [vmem:[#allocation5] sm:$0xff]  ;;  %v58_v9 = vld [vmem:[#allocation2] sm:$0x3]  ;;  %vm382_vm4 = vcmask 254976  }
  0x1d   :  { %425 = vmatpush3.msra.mxu0 %v62_v1  ;;  %436 = vmatpush3.msra.mxu1 %v57_v2  ;;  %v54_v8 = vld [vmem:[%s637_s2] sm:$0xff]  ;;  %v221_v11 = vld [vmem:[%s640_s5 + $0x18] sm:$0xff]  ;;  %v220_v12 = vld [vmem:[%s640_s5 + $0x10] sm:$0xff] }
  0x1e   :  { %426 = vmatprep.subr.mxu0 %v543_v0  ;;  %437 = vmatprep.subr.mxu1 %v543_v0  ;;  %v53_v10 = vld [vmem:[%s635_s0] sm:$0x3]  ;;  %v219_v13 = vld [vmem:[%s640_s5 + $0x8] sm:$0xff] }
  0x1f   :  { %427 = vmatpush3.msra.mxu0 %v61_v3  ;;  %438 = vmatpush3.msra.mxu1 %v56_v4  ;;  %v218_v14 = vld [vmem:[%s640_s5] sm:$0xff]  ;;  %s545_s5 = smov [#allocation7]  }
  0x20   :  { %428 = vmatprep.subr.mxu0 %v543_v0  ;;  %439 = vmatprep.subr.mxu1 %v543_v0  ;;  %v296_v15 = vld [vmem:[%s641_s6] sm:$0xf] }
  0x21   :  { %429 = vmatpush3.msra.mxu0 %v60_v5  ;;  %440 = vmatpush3.msra.mxu1 %v55_v6  ;;  %v402_v18 = vld [vmem:[%s639_s4] ss:$0 sm:$0xff]  ;;  %s390_s4 = sshll.u32 %s545_s5, 4  ;;  %s391_s4 = int_to_ptr.vmem [resolvable:$true] %s390_s4 }
  0x22   :  { %430 = vmatprep.subr.mxu0 %v543_v0  ;;  %441 = vmatprep.subr.mxu1 %v543_v0  ;;  %s513_s6 = scalar_lea.vmem %s391_s4, 32  ;;  %p518_p11 = scmp.lt.s32.totalorder %s391_s4, %s391_s4 }
  0x23   :  { %431 = vmatpush3.msra.mxu0 %v59_v7  ;;  %442 = vmatpush3.msra.mxu1 %v54_v8  ;;  %p514_p10 = scmp.ne.s32.totalorder %s391_s4, %s513_s6  ;;  %p519_p12 = scmp.lt.s32.totalorder %s513_s6, %s513_s6 }
  0x24   :  { %433 = vmatmul.mubr.msk.f32.vlgmr.msra.gmra.mxu0 %vm63_vm1, %v58_v9  ;;  %444 = vmatmul.mubr.msk.f32.vlgmr.msra.gmra.mxu1 %vm63_vm1, %v53_v10 }
  0x25   :  { %446 = vmatprep.subr.mxu0 %v543_v0  ;;  %454 = vmatprep.mubr.msk.f32.mxu0 %vm544_vm0, %v543_v0  ;;  %p520_p13 = por %p519_p12, %p518_p11 }
  0x26   :  { %447 = vmatpush3.msra.mxu0 %v221_v11  ;;  %457 = vmatprep.subr.mxu1 %v543_v0 }
  0x27   :  { %448 = vmatprep.subr.mxu0 %v543_v0  ;;  %459 = vmatprep.mubr.msk.f32.mxu1 %vm544_vm0, %v543_v0  ;;  %p521_p0 = pnand %p520_p13, %p514_p10 }
  0x28   :  { %449 = vmatpush3.msra.mxu0 %v220_v12  ;;  %458 = vmatpush3.msk.msra.mxu1 %vm301_vm2, %v296_v15 }
  0x29   :  { %450 = vmatprep.subr.mxu0 %v543_v0 }
  0x2a   :  { %451 = vmatpush3.msra.mxu0 %v219_v13 }
  0x2b   :  { %452 = vmatprep.subr.mxu0 %v543_v0 }
  0x2c   :  { %453 = vmatpush3.msra.mxu0 %v218_v14 }
  0xe4   :  { %v133_v16 = vpop.f32.mrf.mxu0  ;;  %v206_v17 = vpop.f32.mrf.mxu1 }
  0xe5   :  { %v207_v19 = vadd.f32 %v206_v17, %v133_v16 }
  0xe6   :  { %v434_v20 = vpop.f32.mrf.mxu0  ;;  %v445_v21 = vpop.f32.mrf.mxu1 }
  0xe7   :  { %v217_v22 = vadd.f32 %v402_v18, %v207_v19 }
  0xe9   :  { %455 = vmatmul.mubr.msk.f32.vlgmr.msra.gmra.mxu0 %vm63_vm1, %v217_v22 }
 0x1a9   :  { %v291_v23 = vpop.f32.mrf.mxu0 }
 0x1aa   :  { %v295_v24 = vmax.f32 %v291_v23, 0.0 }
 0x1ab   :  { %v456_v25 = vpop.f32.mrf.mxu0 }
 0x1ac   :  { %460 = vmatmul.mubr.msk.f32.vlgmr.msra.gmra.mxu1 %vm297_vm3, %v295_v24 }
 0x26c   :  { %v371_v26 = vpop.f32.mrf.mxu1 }
 0x26d   :  { %v406_v27 = vmul.f32 -1.442695, %v371_v26 }
 0x26e   :  { %v461_v28 = vpop.f32.mrf.mxu1 }
 0x26f   :  { %469 = vpow2.f32 %v406_v27 }
 0x27c   :  { %v470_v29 = vpop.eup %469 }
 0x27d   :  { %v378_v30 = vadd.f32 1.0, %v470_v29 }
 0x27f   :  { %471 = vrcp.f32 %v378_v30 }
 0x28c   :  { %v472_v31 = vpop.eup %471 }
 0x28d   :  { %v381_v32 = vmul.f32 %v472_v31, %v217_v22 }
 0x28f   :  { %383 = vst.msk [vmem:[#allocation7] sm:$0x3] %vm382_vm4, %v381_v32 }
 0x290   :  { %524 = shalt.err (!%p521_p0)
}
 0x291   :  { %393 = dma.vmem_to_hbm [thread:$0]  %s391_s4, 32, %s642_s7, [#allocation4]  }
 0x292   :  { %537 = dma.done.wait [#allocation4], 32  }
 0x293   :  { %538 = vsyncadd [#allocation4], 4294967264 }
 0x294   :  { %397 = vsyncpa [#allocation3], 1 }
 0x295   :  { %398 = vsyncpa [#allocation6], 1 }
 0x296   :  { %399 = vsyncpa [#allocation4], 1 }

// kernel: tpu_custom_call.1
= control target key start
LH: loop header
LB: loop body
LE: loop exit
PB: predicated region body
PF: predicated region fallthrough
CT: control target
= control target key end

     0   :  { %12 = vsyncpa [#allocation3], 0  ;;  %s635_s0 = inlined_call_operand.vmem [shape: f32[2,32], index: 0, kind: input, shape index: {}]   ;;  %s636_s1 = inlined_call_operand.hbm [shape: f32[2,32], index: 1, kind: input, shape index: {}]   ;;  %s637_s2 = inlined_call_operand.vmem [shape: f32[32,32], index: 2, kind: input, shape index: {}]   ;;  %s638_s3 = inlined_call_operand.hbm [shape: f32[32,32], index: 3, kind: input, shape index: {}]   ;;  %s639_s4 = inlined_call_operand.vmem [shape: f32[1,32], index: 4, kind: input, shape index: {}]   ;;  %s640_s5 = inlined_call_operand.vmem [shape: f32[32,4], index: 5, kind: input, shape index: {}]   ;;  %s641_s6 = inlined_call_operand.vmem [shape: f32[4,32], index: 6, kind: input, shape index: {}]   ;;  %s642_s7 = inlined_call_operand.hbm [shape: f32[2,32], index: 7, kind: output, shape index: {}]  }
   0x1   :  { %13 = vsyncpa [#allocation6], 0 }
   0x2   :  { %14 = vsyncpa [#allocation4], 0  ;;  %s539_s24 = smov [#allocation2]   ;;  %s540_s26 = smov [#allocation5]  }
   0x3   :  { %s23_s25 = sshll.u32 %s539_s24, 4  ;;  %s34_s27 = sshll.u32 %s540_s26, 4  ;;  %s24_s25 = int_to_ptr.vmem [resolvable:$true] %s23_s25  ;;  %s35_s27 = int_to_ptr.vmem [resolvable:$true] %s34_s27 }
   0x4   :  { %s481_s28 = scalar_lea.vmem %s24_s25, 32  ;;  %p486_p1 = scmp.lt.s32.totalorder %s24_s25, %s24_s25 }
   0x5   :  { %p482_p0 = scmp.ne.s32.totalorder %s24_s25, %s481_s28  ;;  %p487_p2 = scmp.lt.s32.totalorder %s481_s28, %s481_s28 }
   0x7   :  { %p488_p3 = por %p487_p2, %p486_p1 }
   0x9   :  { %p489_p4 = pnand %p488_p3, %p482_p0 }
   0xb   :  { %492 = shalt.err (!%p489_p4)
}
   0xc   :  { %26 = dma.hbm_to_vmem [thread:$0]  %s636_s1, 32, %s24_s25, [#allocation3]  }
   0xd   :  { %s501_s8 = scalar_lea.vmem %s35_s27, 512  ;;  %p506_p6 = scmp.lt.s32.totalorder %s35_s27, %s35_s27 }
   0xe   :  { %p502_p5 = scmp.ne.s32.totalorder %s35_s27, %s501_s8  ;;  %p507_p7 = scmp.lt.s32.totalorder %s501_s8, %s501_s8 }
  0x10   :  { %p508_p8 = por %p507_p7, %p506_p6 }
  0x12   :  { %p509_p9 = pnand %p508_p8, %p502_p5 }
  0x14   :  { %512 = shalt.err (!%p509_p9)
}
  0x15   :  { %s541_s9 = smov 128   ;;  %s542_s10 = smov 8  }
  0x16   :  { %40 = dma.hbm_to_vmem [thread:$0]  %s638_s3, 512, %s35_s27, [#allocation6], %s541_s9, %s541_s9, %s542_s10  }
  0x17   :  { %533 = dma.done.wait [#allocation3], 32  }
  0x18   :  { %534 = vsyncadd [#allocation3], 4294967264 }
  0x19   :  { %535 = dma.done.wait [#allocation6], 512  }
  0x1a   :  { %536 = vsyncadd [#allocation6], 4294966784  ;;  %v543_v0 = vmov 0.0   ;;  %vm544_vm0 = vmmov 0   ;;  %v62_v1 = vld [vmem:[#allocation5 + $0x18] sm:$0xff]  ;;  %v61_v3 = vld [vmem:[#allocation5 + $0x10] sm:$0xff] }
  0x1b   :  { %424 = vmatprep.subr.mxu0 %v543_v0  ;;  %435 = vmatprep.subr.mxu1 %v543_v0  ;;  %v57_v2 = vld [vmem:[%s637_s2 + $0x18] sm:$0xff]  ;;  %v56_v4 = vld [vmem:[%s637_s2 + $0x10] sm:$0xff]  ;;  %v55_v6 = vld [vmem:[%s637_s2 + $0x8] sm:$0xff]  ;;  %vm63_vm1 = vcmask 261120   ;;  %vm301_vm2 = vcmask 1043456   ;;  %vm297_vm3 = vcmask 31744  }
  0x1c   :  { %432 = vmatprep.mubr.msk.f32.mxu0 %vm544_vm0, %v543_v0  ;;  %443 = vmatprep.mubr.msk.f32.mxu1 %vm544_vm0, %v543_v0  ;;  %v60_v5 = vld [vmem:[#allocation5 + $0x8] sm:$0xff]  ;;  %v59_v7 = vld [vmem:[#allocation5] sm:$0xff]  ;;  %v58_v9 = vld [vmem:[#allocation2] sm:$0x3]  ;;  %vm382_vm4 = vcmask 254976  }
  0x1d   :  { %425 = vmatpush3.msra.mxu0 %v62_v1  ;;  %436 = vmatpush3.msra.mxu1 %v57_v2  ;;  %v54_v8 = vld [vmem:[%s637_s2] sm:$0xff]  ;;  %v221_v11 = vld [vmem:[%s640_s5 + $0x18] sm:$0xff]  ;;  %v220_v12 = vld [vmem:[%s640_s5 + $0x10] sm:$0xff] }
  0x1e   :  { %426 = vmatprep.subr.mxu0 %v543_v0  ;;  %437 = vmatprep.subr.mxu1 %v543_v0  ;;  %v53_v10 = vld [vmem:[%s635_s0] sm:$0x3]  ;;  %v219_v13 = vld [vmem:[%s640_s5 + $0x8] sm:$0xff] }
  0x1f   :  { %427 = vmatpush3.msra.mxu0 %v61_v3  ;;  %438 = vmatpush3.msra.mxu1 %v56_v4  ;;  %v218_v14 = vld [vmem:[%s640_s5] sm:$0xff]  ;;  %s545_s5 = smov [#allocation7]  }
  0x20   :  { %428 = vmatprep.subr.mxu0 %v543_v0  ;;  %439 = vmatprep.subr.mxu1 %v543_v0  ;;  %v296_v15 = vld [vmem:[%s641_s6] sm:$0xf] }
  0x21   :  { %429 = vmatpush3.msra.mxu0 %v60_v5  ;;  %440 = vmatpush3.msra.mxu1 %v55_v6  ;;  %v402_v18 = vld [vmem:[%s639_s4] ss:$0 sm:$0xff]  ;;  %s390_s4 = sshll.u32 %s545_s5, 4  ;;  %s391_s4 = int_to_ptr.vmem [resolvable:$true] %s390_s4 }
  0x22   :  { %430 = vmatprep.subr.mxu0 %v543_v0  ;;  %441 = vmatprep.subr.mxu1 %v543_v0  ;;  %s513_s6 = scalar_lea.vmem %s391_s4, 32  ;;  %p518_p11 = scmp.lt.s32.totalorder %s391_s4, %s391_s4 }
  0x23   :  { %431 = vmatpush3.msra.mxu0 %v59_v7  ;;  %442 = vmatpush3.msra.mxu1 %v54_v8  ;;  %p514_p10 = scmp.ne.s32.totalorder %s391_s4, %s513_s6  ;;  %p519_p12 = scmp.lt.s32.totalorder %s513_s6, %s513_s6 }
  0x24   :  { %433 = vmatmul.mubr.msk.f32.vlgmr.msra.gmra.mxu0 %vm63_vm1, %v58_v9  ;;  %444 = vmatmul.mubr.msk.f32.vlgmr.msra.gmra.mxu1 %vm63_vm1, %v53_v10 }
  0x25   :  { %446 = vmatprep.subr.mxu0 %v543_v0  ;;  %454 = vmatprep.mubr.msk.f32.mxu0 %vm544_vm0, %v543_v0  ;;  %p520_p13 = por %p519_p12, %p518_p11 }
  0x26   :  { %447 = vmatpush3.msra.mxu0 %v221_v11  ;;  %457 = vmatprep.subr.mxu1 %v543_v0 }
  0x27   :  { %448 = vmatprep.subr.mxu0 %v543_v0  ;;  %459 = vmatprep.mubr.msk.f32.mxu1 %vm544_vm0, %v543_v0  ;;  %p521_p0 = pnand %p520_p13, %p514_p10 }
  0x28   :  { %449 = vmatpush3.msra.mxu0 %v220_v12  ;;  %458 = vmatpush3.msk.msra.mxu1 %vm301_vm2, %v296_v15 }
  0x29   :  { %450 = vmatprep.subr.mxu0 %v543_v0 }
  0x2a   :  { %451 = vmatpush3.msra.mxu0 %v219_v13 }
  0x2b   :  { %452 = vmatprep.subr.mxu0 %v543_v0 }
  0x2c   :  { %453 = vmatpush3.msra.mxu0 %v218_v14 }
  0xe4   :  { %v133_v16 = vpop.f32.mrf.mxu0  ;;  %v206_v17 = vpop.f32.mrf.mxu1 }
  0xe5   :  { %v207_v19 = vadd.f32 %v206_v17, %v133_v16 }
  0xe6   :  { %v434_v20 = vpop.f32.mrf.mxu0  ;;  %v445_v21 = vpop.f32.mrf.mxu1 }
  0xe7   :  { %v217_v22 = vadd.f32 %v402_v18, %v207_v19 }
  0xe9   :  { %455 = vmatmul.mubr.msk.f32.vlgmr.msra.gmra.mxu0 %vm63_vm1, %v217_v22 }
 0x1a9   :  { %v291_v23 = vpop.f32.mrf.mxu0 }
 0x1aa   :  { %v295_v24 = vmax.f32 %v291_v23, 0.0 }
 0x1ab   :  { %v456_v25 = vpop.f32.mrf.mxu0 }
 0x1ac   :  { %460 = vmatmul.mubr.msk.f32.vlgmr.msra.gmra.mxu1 %vm297_vm3, %v295_v24 }
 0x26c   :  { %v371_v26 = vpop.f32.mrf.mxu1 }
 0x26d   :  { %v406_v27 = vmul.f32 -1.442695, %v371_v26 }
 0x26e   :  { %v461_v28 = vpop.f32.mrf.mxu1 }
 0x26f   :  { %469 = vpow2.f32 %v406_v27 }
 0x27c   :  { %v470_v29 = vpop.eup %469 }
 0x27d   :  { %v378_v30 = vadd.f32 1.0, %v470_v29 }
 0x27f   :  { %471 = vrcp.f32 %v378_v30 }
 0x28c   :  { %v472_v31 = vpop.eup %471 }
 0x28d   :  { %v381_v32 = vmul.f32 %v472_v31, %v217_v22 }
 0x28f   :  { %383 = vst.msk [vmem:[#allocation7] sm:$0x3] %vm382_vm4, %v381_v32 }
 0x290   :  { %524 = shalt.err (!%p521_p0)
}
 0x291   :  { %393 = dma.vmem_to_hbm [thread:$0]  %s391_s4, 32, %s642_s7, [#allocation4]  }
 0x292   :  { %537 = dma.done.wait [#allocation4], 32  }
 0x293   :  { %538 = vsyncadd [#allocation4], 4294967264 }
 0x294   :  { %397 = vsyncpa [#allocation3], 1 }
 0x295   :  { %398 = vsyncpa [#allocation6], 1 }
 0x296   :  { %399 = vsyncpa [#allocation4], 1 }

</bundles_post_ra>
